<compile_context>
chip_gen: v6e
topology: v6e:2x2x1
jax: 0.10.0
libtpu: 0.0.40
codegen_flags: <defaults>
</compile_context>

<pallas_src>
import math

import numpy as np

import jax
import jax.numpy as jnp
from jax.experimental import pallas as pl
from jax.experimental.pallas import tpu as pltpu


def _round_up(x, m):
    return ((x + m - 1) // m) * m


def _sinusoidal_kernel(t_ref, tab_ref, out_ref):
    """t_ref:   (tb, R) f32  -- R packed timesteps per output row.
    tab_ref:    (2, W)  f32  -- row 0 = frequencies (tiled), row 1 = phase (0 | pi/2).
    out_ref:    (tb, W) f32  -- W = R * dim; each row holds R consecutive embeddings,
                               laid out [sin(t0*f), cos(t0*f), sin(t1*f), cos(t1*f), ...].
    """
    tb, W = out_ref.shape
    R = t_ref.shape[-1]
    sub_dim = W // R  # = dim

    freqs = tab_ref[0:1, :]   # (1, W)
    phase = tab_ref[1:2, :]   # (1, W)

    t = t_ref[...]            # (tb, R)
    t_full = t[:, 0:1]        # (tb, 1); broadcast over lanes below
    if R > 1:
        lane = jax.lax.broadcasted_iota(jnp.int32, (tb, W), 1)
        for r in range(1, R):
            # lanes [r*sub_dim, (r+1)*sub_dim) take timestep r of this packed row
            t_full = jnp.where(lane >= r * sub_dim, t[:, r:r + 1], t_full)

    # cos(x) = sin(x + pi/2): one transcendental pass, one unmasked 128-lane store.
    out_ref[...] = jnp.sin(t_full * freqs + phase)


def _reference_jax(time, dim):
    """Pure-JAX expression mirroring the PyTorch forward (used for tiny sizes,
    where it fuses into the surrounding XLA graph)."""
    half = dim // 2
    scale = math.log(10000.0) / (half - 1)
    freqs = jnp.exp(jnp.arange(half, dtype=jnp.float32) * -scale)
    args = time.astype(jnp.float32)[:, None] * freqs[None, :]
    return jnp.concatenate([jnp.sin(args), jnp.cos(args)], axis=-1)


def sinusoidal_position_embeddings(time, dim, *, block_rows=2048,
                                   min_kernel_elements=1 << 16):
    """time: (B,) float timesteps -> (B, dim) float32 embeddings
    (sin in [:, :dim//2], cos in [:, dim//2:], matching torch.cat((sin, cos), -1))."""
    assert dim % 2 == 0 and dim >= 4, "dim must be even and >= 4"
    time = jnp.asarray(time, dtype=jnp.float32)
    B = time.shape[0]
    half = dim // 2

    # Tiny problems: launch overhead dominates -> stay fused in XLA.
    if B * dim < min_kernel_elements:
        return _reference_jax(time, dim)

    # Lane packing factor: R consecutive embedding rows per 128-lane output row.
    R = 128 // dim if (dim <= 128 and 128 % dim == 0) else 1
    W = R * dim

    # Frequency / phase tables: function of dim only, built once on the host.
    scale = math.log(10000.0) / (half - 1)
    freqs_half = np.exp(np.arange(half, dtype=np.float64) * -scale)
    freq_row = np.tile(np.concatenate([freqs_half, freqs_half]), R)                   # (W,)
    phase_row = np.tile(np.concatenate([np.zeros(half), np.full(half, np.pi / 2.0)]), R)
    table = jnp.asarray(np.stack([freq_row, phase_row]), dtype=jnp.float32)           # (2, W)

    # Pack timesteps: packed row p holds timesteps [p*R, ..., p*R + R - 1].
    B_eff = _round_up(B, R)
    t_in = time if B_eff == B else jnp.pad(time, (0, B_eff - B))
    P = B_eff // R
    t_packed = t_in.reshape(P, R)

    # Tile rows: big tiles (~1 MiB output tile) but always >= 2 grid tiles once
    # P >= 16 so the "parallel" axis can shard across v7x's two TensorCores.
    # Edge blocks are masked by Pallas -- no padding to the tile size.
    if P < 16:
        tb = P                                            # single full-extent block
    else:
        tb = min(block_rows, _round_up(pl.cdiv(P, 2), 8))  # multiple of 8, >= 2 tiles
    grid = (pl.cdiv(P, tb),)

    out = pl.pallas_call(
        _sinusoidal_kernel,
        out_shape=jax.ShapeDtypeStruct((P, W), jnp.float32),
        grid=grid,
        in_specs=[
            pl.BlockSpec((tb, R), lambda i: (i, 0)),   # per-tile packed timesteps
            pl.BlockSpec((2, W), lambda i: (0, 0)),    # shared freq/phase table
        ],
        out_specs=pl.BlockSpec((tb, W), lambda i: (i, 0)),
        compiler_params=pltpu.CompilerParams(
            dimension_semantics=("parallel",)),        # shard tiles across TCs (v7x)
    )(t_packed, table)

    # Row-major (P, R*dim) is bit-identical to (B_eff, dim): free metadata reshape.
    out = out.reshape(B_eff, dim)
    # Slice only in the rare B % R != 0 case (otherwise no output copy at all).
    return out if B_eff == B else out[:B]


def _reference_np(time_np, dim):
    """Float64 numpy reference mirroring the PyTorch forward exactly."""
    half = dim // 2
    scale = math.log(10000.0) / (half - 1)
    freqs = np.exp(np.arange(half, dtype=np.float64) * -scale)
    args = time_np.astype(np.float64)[:, None] * freqs[None, :]
    return np.concatenate([np.sin(args), np.cos(args)], axis=-1)


if __name__ == "__main__":
    key = jax.random.PRNGKey(0)

    # (B, dim, kwargs): cover the XLA-fallback path, the forced-kernel tiny path,
    # the packed multi-tile path, the odd-batch edge path, and a dim>=128 path.
    cases = [
        (8, 64, {}),                                        # shipped size -> fused XLA path
        (8, 64, dict(min_kernel_elements=0)),               # force kernel, single block
        (1024, 64, {}),                                      # kernel path, 2 lane-dense tiles
        (37, 64, dict(min_kernel_elements=0)),               # odd batch -> edge mask + slice
        (24, 128, dict(min_kernel_elements=0, block_rows=8)),  # dim=128 (R=1), 3 tiles
    ]

    for idx, (B, DIM, kw) in enumerate(cases):
        k = jax.random.fold_in(key, idx)
        # Diffusion-style timesteps: deterministic integers in [0, 1000)
        t = jax.random.randint(k, (B,), 0, 1000).astype(jnp.float32)

        out = jax.block_until_ready(sinusoidal_position_embeddings(t, DIM, **kw))
        assert out.shape == (B, DIM), (idx, out.shape)
        assert out.dtype == jnp.float32, (idx, out.dtype)

        ref = _reference_np(np.asarray(t), DIM)
        err = float(np.max(np.abs(np.asarray(out, dtype=np.float64) - ref)))
        # Tolerance covers f32 argument rounding + hardware sin range reduction at
        # |arg| ~ 1e3 radians (and the cos(x)=sin(x+pi/2) fusion, ~|x|*eps extra);
        # any real layout / frequency / swapped-half bug produces O(1) error.
        assert err < 5e-3, f"case {idx} (B={B}, dim={DIM}): max abs err = {err}"

    print("KERNEL_OK")
</pallas_src>

<mosaic_0001>
module attributes {stable_mosaic.version = 11 : i64} {
  func.func @_sinusoidal_kernel(%arg0: i32, %arg1: memref<4x2xf32, #tpu.memory_space<vmem>>, %arg2: memref<2x128xf32, #tpu.memory_space<vmem>>, %arg3: memref<4x128xf32, #tpu.memory_space<vmem>>) attributes {dimension_semantics = [#tpu.dimension_semantics<parallel>], iteration_bounds = array<i64: 1>, scalar_prefetch = 0 : i64, scratch_operands = 0 : i64, tpu.core_type = #tpu.core_type<tc>, window_params = [{transform_indices = @transform_0, window_bounds = array<i64: 4, 2>}, {pipeline_mode = #tpu.pipeline_mode<synchronous>, transform_indices = @transform_1, window_bounds = array<i64: 2, 128>}, {transform_indices = @transform_2, window_bounds = array<i64: 4, 128>}]} {
    %c0 = arith.constant 0 : index
    %c0_0 = arith.constant 0 : index
    %0 = vector.load %arg2[%c0, %c0_0] : memref<2x128xf32, #tpu.memory_space<vmem>>, vector<1x128xf32>
    %c1 = arith.constant 1 : index
    %c0_1 = arith.constant 0 : index
    %1 = vector.load %arg2[%c1, %c0_1] : memref<2x128xf32, #tpu.memory_space<vmem>>, vector<1x128xf32>
    %c0_2 = arith.constant 0 : index
    %c0_3 = arith.constant 0 : index
    %2 = vector.load %arg1[%c0_2, %c0_3] : memref<4x2xf32, #tpu.memory_space<vmem>>, vector<4x2xf32>
    %3 = vector.extract_strided_slice %2 {offsets = [0, 0], sizes = [4, 1], strides = [1, 1]} : vector<4x2xf32> to vector<4x1xf32>
    %4 = tpu.iota {dimensions = array<i32: 1>} : vector<4x128xi32>
    %c64_i32 = arith.constant 64 : i32
    %5 = vector.broadcast %c64_i32 : i32 to vector<4x128xi32>
    %6 = arith.cmpi sge, %4, %5 : vector<4x128xi32>
    %7 = vector.extract_strided_slice %2 {offsets = [0, 1], sizes = [4, 1], strides = [1, 1]} : vector<4x2xf32> to vector<4x1xf32>
    %8 = vector.shape_cast %7 : vector<4x1xf32> to vector<4x1xf32>
    %9 = vector.broadcast %8 : vector<4x1xf32> to vector<4x128xf32>
    %10 = vector.shape_cast %3 : vector<4x1xf32> to vector<4x1xf32>
    %11 = vector.broadcast %10 : vector<4x1xf32> to vector<4x128xf32>
    %12 = arith.select %6, %9, %11 : vector<4x128xi1>, vector<4x128xf32>
    %13 = vector.broadcast %0 : vector<1x128xf32> to vector<4x128xf32>
    %14 = arith.mulf %12, %13 : vector<4x128xf32>
    %15 = vector.broadcast %1 : vector<1x128xf32> to vector<4x128xf32>
    %16 = arith.addf %14, %15 : vector<4x128xf32>
    %17 = math.sin %16 : vector<4x128xf32>
    %c0_4 = arith.constant 0 : index
    %c0_5 = arith.constant 0 : index
    %18 = vector.load %arg3[%c0_4, %c0_5] : memref<4x128xf32, #tpu.memory_space<vmem>>, vector<4x128xf32>
    tpu.vector_store %arg3[%c0_4, %c0_5], %17 {strides = array<i32>} : memref<4x128xf32, #tpu.memory_space<vmem>>, vector<4x128xf32>,
    return
  }
  func.func @transform_0(%arg0: i32) -> (i32, i32) {
    %c0_i32 = arith.constant 0 : i32
    %c0_i32_0 = arith.constant 0 : i32
    return %arg0, %c0_i32 : i32, i32
  }
  func.func @transform_1(%arg0: i32) -> (i32, i32) {
    %c0_i32 = arith.constant 0 : i32
    %c0_i32_0 = arith.constant 0 : i32
    %c0_i32_1 = arith.constant 0 : i32
    return %c0_i32, %c0_i32_0 : i32, i32
  }
  func.func @transform_2(%arg0: i32) -> (i32, i32) {
    %c0_i32 = arith.constant 0 : i32
    %c0_i32_0 = arith.constant 0 : i32
    return %arg0, %c0_i32 : i32, i32
  }
}

</mosaic_0001>

<bundles_post_ra>
// kernel: tpu_custom_call.1
= control target key start
LH: loop header
LB: loop body
LE: loop exit
PB: predicated region body
PF: predicated region fallthrough
CT: control target
= control target key end

     0   :  { %s261_s0 = inlined_call_operand.vmem [shape: f32[4,2], index: 0, kind: input, shape index: {}]   ;;  %s262_s1 = inlined_call_operand.vmem [shape: f32[2,128], index: 1, kind: input, shape index: {}]   ;;  %s263_s2 = inlined_call_operand.hbm [shape: f32[4,128], index: 2, kind: output, shape index: {}]  }
   0x1   :  { %v14_v0 = vld [vmem:[%s261_s0] sm:$0xf] }
   0x2   :  { %7 = vsyncpa [#allocation3], 0  ;;  %v204_v1 = vmov 1   ;;  %v205_v2 = vmov 0   ;;  %v15_v3 = vlaneseq  ;;  %v157_v6 = vld [vmem:[%s262_s1] ss:$0 sm:$0xff] }
   0x3   :  { %176 = vset.pattern.permute.xlu0 %v204_v1  ;;  %v158_v8 = vld [vmem:[%s262_s1 + $0x1] ss:$0 sm:$0xff]  ;;  %v206_v22 = vmov 683565275   ;;  %v207_v24 = vmov 2475754826  }
   0x4   :  { %20 = vperm.xlu0 %176, %v14_v0   ;;  %v16_v4 = vand.u32 127, %v15_v3  ;;  %v208_v27 = vmov 2131351028   ;;  %v209_v30 = vmov 2102212464   ;;  %s212_s0 = smov [#allocation2]  }
   0x5   :  { %v210_v33 = vmov 920167782   ;;  %v211_v36 = vmov 1326507024   ;;  %s149_s1 = sshll.u32 %s212_s0, 4  ;;  %s150_s1 = int_to_ptr.vmem [resolvable:$true] %s149_s1 }
   0x6   :  { %vm17_vm0 = vcmp.ge.s32.totalorder %v16_v4, 64  ;;  %s182_s15 = scalar_lea.vmem %s150_s1, 64  ;;  %p187_p1 = scmp.lt.s32.totalorder %s150_s1, %s150_s1 }
   0x7   :  { %p183_p0 = scmp.ne.s32.totalorder %s150_s1, %s182_s15  ;;  %p188_p2 = scmp.lt.s32.totalorder %s182_s15, %s182_s15 }
   0x8   :  { %177 = vset.pattern.permute.xlu0 %v205_v2 }
   0x9   :  { %24 = vperm.xlu0 %177, %v14_v0   ;;  %p189_p3 = por %p188_p2, %p187_p1 }
   0xb   :  { %p190_p4 = pnand %p189_p3, %p183_p0 }
  0x7f   :  { %v21_v5 = vpop.permute.xlu0 %20 }
  0x84   :  { %v25_v7 = vpop.permute.xlu0 %24 }
  0x85   :  { %v27_v9 = vsel %vm17_vm0, %v21_v5, %v25_v7 }
  0x86   :  { %v32_v10 = vmul.f32 %v157_v6, %v27_v9 }
  0x88   :  { %v237_v11 = vadd.f32 %v158_v8, %v32_v10 }
  0x8a   :  { %v41_v12 = vand.u32 2139095040, %v237_v11  ;;  %v38_v16 = vand.u32 2147483647, %v237_v11  ;;  %vm40_vm8 = vcmp.lt.s32.totalorder %v237_v11, 0  ;;  %vm130_vm13 = vweird.f32 %v237_v11 }
  0x8c   :  { %v42_v13 = vshrl.u32 %v41_v12, 23  ;;  %v45_v20 = vand.u32 8388607, %v38_v16  ;;  %vm39_vm9 = vcmp.le.f32.partialorder %v38_v16, 0.7853982 }
  0x8e   :  { %v159_v14 = vadd.s32 4294967169, %v42_v13  ;;  %v46_v38 = vor.u32 8388608, %v45_v20 }
  0x90   :  { %v48_v15 = vadd.s32 1, %v159_v14  ;;  %v86_v52 = vshll.u32 %v46_v38, 8 }
  0x92   :  { %vm49_vm1 = vcmp.gt.s32.totalorder %v48_v15, 0 }
  0x93   :  { %v50_v17 = vsel %vm49_vm1, %v48_v15, 0 }
  0x94   :  { %v52_v18 = vand.u32 31, %v50_v17  ;;  %v51_v21 = vshrl.u32 %v50_v17, 5 }
  0x96   :  { %v53_v19 = vsub.s32 32, %v52_v18  ;;  %v55_v23 = vshll.u32 %v206_v22, %v52_v18  ;;  %v58_v25 = vshll.u32 %v207_v24, %v52_v18  ;;  %v61_v29 = vshll.u32 %v208_v27, %v52_v18 }
  0x97   :  { %v64_v32 = vshll.u32 %v209_v30, %v52_v18  ;;  %v67_v35 = vshll.u32 %v210_v33, %v52_v18  ;;  %vm70_vm2 = vcmp.lt.s32.totalorder %v51_v21, 1  ;;  %vm73_vm3 = vcmp.lt.s32.totalorder %v51_v21, 4 }
  0x98   :  { %v56_v26 = vshrl.u32 %v207_v24, %v53_v19  ;;  %v59_v28 = vshrl.u32 %v208_v27, %v53_v19  ;;  %v62_v31 = vshrl.u32 %v209_v30, %v53_v19  ;;  %v65_v34 = vshrl.u32 %v210_v33, %v53_v19 }
  0x99   :  { %v68_v37 = vshrl.u32 %v211_v36, %v53_v19  ;;  %v54_v47 = vshrl.u32 %v206_v22, %v53_v19  ;;  %vm72_vm4 = vcmp.lt.s32.totalorder %v51_v21, 3  ;;  %vm71_vm5 = vcmp.lt.s32.totalorder %v51_v21, 2 }
  0x9a   :  { %v57_v39 = vor.u32 %v56_v26, %v55_v23  ;;  %v60_v40 = vor.u32 %v59_v28, %v58_v25  ;;  %v63_v41 = vor.u32 %v62_v31, %v61_v29  ;;  %v66_v42 = vor.u32 %v65_v34, %v64_v32 }
  0x9b   :  { %v69_v43 = vor.u32 %v68_v37, %v67_v35 }
  0x9c   :  { %v75_v44 = vsel %vm73_vm3, %v63_v41, 2102212464  ;;  %v78_v45 = vsel %vm70_vm2, %v57_v39, %v60_v40  ;;  %v82_v46 = vsel %vm70_vm2, %v60_v40, %v63_v41  ;;  %v79_v48 = vsel %vm73_vm3, %v66_v42, 920167782 }
  0x9d   :  { %v83_v49 = vsel %vm73_vm3, %v69_v43, 1326507024  ;;  %v80_v50 = vsel %vm72_vm4, %v63_v41, %v79_v48  ;;  %v74_v53 = vsel %vm70_vm2, %v54_v47, %v57_v39  ;;  %v76_v54 = vsel %vm72_vm4, %v60_v40, %v75_v44 }
  0x9e   :  { %v84_v51 = vsel %vm72_vm4, %v66_v42, %v83_v49  ;;  %v81_v55 = vsel %vm71_vm5, %v78_v45, %v80_v50  ;;  %v77_v61 = vsel %vm71_vm5, %v74_v53, %v76_v54 }
  0x9f   :  { %v85_v56 = vsel %vm71_vm5, %v82_v46, %v84_v51  ;;  %v246_v59 = vmul.u32.u64.low %v86_v52, %v81_v55  ;;  %v247_v60 = vmul.u32.u64.high %v86_v52, %v81_v55, %v246_v59  ;;  %v93_v63 = vmul.u32 %v86_v52, %v77_v61 }
  0xa0   :  { %v243_v57 = vmul.u32.u64.low %v86_v52, %v85_v56  ;;  %v244_v58 = vmul.u32.u64.high %v86_v52, %v85_v56, %v243_v57 }
  0xa1   :  { %v96_v62 = vadd.s32 1, %v247_v60 }
  0xa2   :  { %vm95_vm6 = vc.u32 %v244_v58, %v246_v59  ;;  %v94_v12 = vadd.s32 %v246_v59, %v244_v58 }
  0xa3   :  { %v97_v0 = vsel %vm95_vm6, %v96_v62, %v247_v60 }
  0xa4   :  { %v98_v1 = vadd.s32 %v97_v0, %v93_v63 }
  0xa6   :  { %v99_v2 = vadd.s32 536870912, %v98_v1 }
  0xa8   :  { %v100_v3 = vshrl.u32 %v99_v2, 30 }
  0xaa   :  { %v101_v4 = vshll.u32 %v100_v3, 30  ;;  %v124_v26 = vsub.s32 4, %v100_v3 }
  0xac   :  { %v102_v5 = vsub.s32 %v98_v1, %v101_v4  ;;  %v125_v29 = vsel %vm40_vm8, %v124_v26, %v100_v3 }
  0xad   :  { %v127_v30 = vsel %vm39_vm9, 0, %v125_v29 }
  0xae   :  { %v104_v6 = vsub.s32 0, %v102_v5  ;;  %v131_v31 = vadd.s32 3, %v127_v30 }
  0xb0   :  { %v160_v7 = vmin.u32 %v104_v6, %v102_v5  ;;  %v132_v32 = vand.u32 3, %v131_v31 }
  0xb2   :  { %v106_v8 = vclz %v160_v7  ;;  %vm137_vm10 = vcmp.eq.s32.totalorder %v132_v32, 2  ;;  %vm134_vm11 = vcmp.eq.s32.totalorder %v132_v32, 0  ;;  %vm133_vm12 = vcmp.lt.s32.totalorder %v132_v32, 2 }
  0xb4   :  { %v161_v9 = vadd.s32 4294967294, %v106_v8 }
  0xb6   :  { %vm162_vm7 = vcmp.lt.s32.totalorder %v161_v9, 0 }
  0xb7   :  { %v109_v10 = vsel %vm162_vm7, 0, %v161_v9 }
  0xb8   :  { %v110_v13 = vsub.s32 32, %v109_v10  ;;  %v114_v14 = vsub.s32 4294967266, %v109_v10  ;;  %v111_v15 = vshll.u32 %v102_v5, %v109_v10 }
  0xba   :  { %v112_v17 = vshrl.u32 %v94_v12, %v110_v13  ;;  %v115_v18 = vadd.s32 127, %v114_v14 }
  0xbc   :  { %v113_v19 = vor.u32 %v112_v17, %v111_v15  ;;  %v116_v20 = vshll.u32 %v115_v18, 23 }
  0xbe   :  { %v117_v21 = vor.u32 4788187, %v116_v20  ;;  %v120_v23 = vcvt.s32.f32 %v113_v19 }
  0xc0   :  { %v118_v22 = vand.u32 2147483647, %v117_v21 }
  0xc2   :  { %v121_v24 = vmul.f32 %v120_v23, %v118_v22 }
  0xc4   :  { %v122_v25 = vxor.u32 2147483648, %v121_v24 }
  0xc6   :  { %v123_v27 = vsel %vm40_vm8, %v122_v25, %v121_v24 }
  0xc7   :  { %v126_v28 = vsel %vm39_vm9, %v237_v11, %v123_v27 }
  0xc8   :  { %178 = vcosq.f32 %v126_v28 }
  0xc9   :  { %180 = vsinq.f32 %v126_v28 }
  0xd5   :  { %v179_v33 = vpop.eup %178 }
  0xd6   :  { %v181_v34 = vpop.eup %180  ;;  %v138_v35 = vxor.u32 2147483648, %v179_v33 }
  0xd7   :  { %v135_v36 = vxor.u32 2147483648, %v181_v34 }
  0xd8   :  { %v139_v37 = vsel %vm137_vm10, %v138_v35, %v181_v34 }
  0xd9   :  { %v136_v16 = vsel %vm134_vm11, %v179_v33, %v135_v36 }
  0xda   :  { %v140_v38 = vsel %vm133_vm12, %v136_v16, %v139_v37 }
  0xdb   :  { %v141_v39 = vsel %vm130_vm13, nan, %v140_v38 }
  0xdc   :  { %142 = vst [vmem:[#allocation2] sm:$0xf] %v141_v39 }
  0xdd   :  { %193 = shalt.err (!%p190_p4)
}
  0xde   :  { %152 = dma.vmem_to_hbm [thread:$0]  %s150_s1, 64, %s263_s2, [#allocation3]  }
  0xdf   :  { %202 = dma.done.wait [#allocation3], 64  }
  0xe0   :  { %203 = vsyncadd [#allocation3], 4294967232 }
  0xe1   :  { %156 = vsyncpa [#allocation3], 1 }

</bundles_post_ra>
